<compile_context>
chip_gen: v6e
topology: v6e:2x2x1
jax: 0.10.0
libtpu: 0.0.40
codegen_flags: <defaults>
</compile_context>

<pallas_src>
import functools

import jax
import jax.numpy as jnp
from jax.experimental import pallas as pl
from jax.experimental.pallas import tpu as pltpu


# ----------------------------------------------------------------------------
# Path A kernel: 1x1 conv == flat matmul.  Grid = (M_tiles,).
# refs: x_ref (TM, Cin) bf16, w_ref (Cin, Cout_pad) bf16,
#       [b_ref (1, Cout_pad) f32,]  o_ref (TM, Cout_pad) f32.
# ----------------------------------------------------------------------------
def _pointwise_kernel(*refs, has_bias):
    if has_bias:
        x_ref, w_ref, b_ref, o_ref = refs
    else:
        x_ref, w_ref, o_ref = refs
        b_ref = None
    acc = jnp.dot(x_ref[...], w_ref[...], preferred_element_type=jnp.float32)
    if has_bias:
        acc = acc + b_ref[...]                 # (1, Cout_pad) broadcasts over M
    o_ref[...] = acc


# ----------------------------------------------------------------------------
# Path B kernel: general KHxKW.  Grid = (N_tiles, Ho, KH); kh is the reduction
# axis (innermost, "arbitrary"); output tile is the resident f32 accumulator.
# refs: x_ref (TN, 1, sw, Ws, Cin) bf16, w_ref (KH*KW, Cin, Cout_pad) bf16,
#       [b_ref (1, Cout_pad) f32,]  out_ref (TN, 1, Wo, Cout_pad) f32.
# ----------------------------------------------------------------------------
def _conv_tap_kernel(*refs, KW, Wo, sw, dw, has_bias):
    if has_bias:
        x_ref, w_ref, b_ref, out_ref = refs
    else:
        x_ref, w_ref, out_ref = refs
        b_ref = None

    kh = pl.program_id(2)
    TN = out_ref.shape[0]
    cout_pad = out_ref.shape[-1]

    acc = None
    for kw in range(KW):                     # static, small (1/3/5)
        rw = (kw * dw) % sw                  # W stride-phase of this tap
        qw = (kw * dw) // sw                 # offset within the phase
        lhs = x_ref[:, 0, rw, qw:qw + Wo, :]            # (TN, Wo, Cin) bf16
        lhs = lhs.reshape(TN * Wo, lhs.shape[-1])       # (TN*Wo, Cin)
        w_t = w_ref[kh * KW + kw]                       # (Cin, Cout_pad) bf16
        d = jnp.dot(lhs, w_t, preferred_element_type=jnp.float32)
        acc = d if acc is None else acc + d
    acc = acc.reshape(TN, 1, Wo, cout_pad)

    # kh == 0: store the fresh accumulator (+bias) directly — no separate
    # zero/bias init pass over the f32 output tile.
    @pl.when(kh == 0)
    def _first():
        if has_bias:
            out_ref[...] = acc + b_ref[...].reshape(1, 1, 1, cout_pad)
        else:
            out_ref[...] = acc

    @pl.when(kh != 0)
    def _accum():
        out_ref[...] += acc


# ----------------------------------------------------------------------------
# Path A wrapper: 1x1 conv as a large-tile matmul.
# ----------------------------------------------------------------------------
def _conv_1x1(x_nchw, w_oihw, bias, *, sh, sw, ph, pw, Ho, Wo, Cout_pad):
    N, Cin, H, W = x_nchw.shape
    Cout = w_oihw.shape[0]
    has_bias = bias is not None

    # Glue: NCHW -> NHWC (bf16), pad, stride-subsample, flatten to (M, Cin).
    x = jnp.transpose(x_nchw, (0, 2, 3, 1)).astype(jnp.bfloat16)
    if ph or pw:
        x = jnp.pad(x, ((0, 0), (ph, ph), (pw, pw), (0, 0)))
    if sh != 1 or sw != 1:
        x = x[:, ::sh, ::sw, :]
    x = x[:, :Ho, :Wo, :]
    M = N * Ho * Wo
    x = x.reshape(M, Cin)

    # Big M tiles (target up to 1024 rows) to amortize per-grid-step overhead
    # and fill the MXU; capped so double-buffered x/out tiles stay well inside
    # a 40 MiB VMEM budget (safe for v7x's 64 MiB physical VMEM).
    TM = min(1024, -(-M // 16) * 16)
    per_row = Cin * 2 + Cout_pad * 4
    vmem_budget = 24 * 1024 * 1024
    max_tm = max(16, (vmem_budget // (2 * per_row)) // 16 * 16)
    TM = max(16, min(TM, max_tm))
    Mpad = -(-M // TM) * TM
    if Mpad != M:
        x = jnp.pad(x, ((0, Mpad - M), (0, 0)))

    w = jnp.transpose(w_oihw.reshape(Cout, Cin), (1, 0)).astype(jnp.bfloat16)
    w = jnp.pad(w, ((0, 0), (0, Cout_pad - Cout)))

    args = [x, w]
    in_specs = [
        pl.BlockSpec((TM, Cin), lambda i: (i, 0)),
        pl.BlockSpec((Cin, Cout_pad), lambda i: (0, 0)),   # resident weight
    ]
    if has_bias:
        b = jnp.pad(bias.astype(jnp.float32), (0, Cout_pad - Cout))
        args.append(b.reshape(1, Cout_pad))
        in_specs.append(pl.BlockSpec((1, Cout_pad), lambda i: (0, 0)))

    kernel = functools.partial(_pointwise_kernel, has_bias=has_bias)

    flops = 2 * Mpad * Cin * Cout_pad
    bytes_accessed = (Mpad * Cin * 2 + Cin * Cout_pad * 2
                      + Mpad * Cout_pad * 4)

    out = pl.pallas_call(
        kernel,
        out_shape=jax.ShapeDtypeStruct((Mpad, Cout_pad), jnp.float32),
        grid_spec=pltpu.PrefetchScalarGridSpec(
            num_scalar_prefetch=0,
            grid=(Mpad // TM,),
            in_specs=in_specs,
            out_specs=pl.BlockSpec((TM, Cout_pad), lambda i: (i, 0)),
        ),
        compiler_params=pltpu.CompilerParams(
            dimension_semantics=("parallel",),
            vmem_limit_bytes=40 * 1024 * 1024,
        ),
        cost_estimate=pl.CostEstimate(flops=flops, transcendentals=0,
                                      bytes_accessed=bytes_accessed),
    )(*args)

    out = out[:M, :Cout].reshape(N, Ho, Wo, Cout)
    return jnp.transpose(out, (0, 3, 1, 2))               # back to NCHW (f32)


# ----------------------------------------------------------------------------
# Path B wrapper: general KHxKW conv with fused im2col via index_map.
# ----------------------------------------------------------------------------
def _conv_kxk(x_nchw, w_oihw, bias, *, sh, sw, ph, pw, dh, dw, KH, KW,
              Ho, Wo, Cout_pad):
    N, Cin, H, W = x_nchw.shape
    Cout = w_oihw.shape[0]
    has_bias = bias is not None

    Hp = H + 2 * ph
    Wp = W + 2 * pw

    # W-phase split sizing: need positions 0 .. Wo-1 + (dw*(KW-1))//sw.
    # (When sw == 1 this degenerates to a trivial reshape — no extra pad.)
    Ws = Wo + (dw * (KW - 1)) // sw
    Ws_arr = max(Ws, -(-Wp // sw))
    Wp2 = Ws_arr * sw

    # Batch tile: target >= ~512 MXU rows (TN*Wo) per grid step, VMEM-capped.
    out_tile_row = Wo * Cout_pad * 4
    x_tile_row = sw * Ws_arr * Cin * 2
    vmem_budget = 24 * 1024 * 1024
    max_tn = max(1, vmem_budget // (2 * (out_tile_row + x_tile_row)))
    TN = max(1, min(N, -(-512 // Wo), max_tn))
    Npad = -(-N // TN) * TN

    # --- glue: NCHW -> NHWC (bf16), pad batch/space, W stride-phase split.
    x = jnp.transpose(x_nchw, (0, 2, 3, 1)).astype(jnp.bfloat16)
    x = jnp.pad(x, ((0, Npad - N), (ph, ph), (pw, pw + Wp2 - Wp), (0, 0)))
    x = x.reshape(Npad, Hp, Ws_arr, sw, Cin)
    x = jnp.transpose(x, (0, 1, 3, 2, 4))            # (Npad, Hp, sw, Ws, Cin)

    # OIHW -> (KH, KW, Cin, Cout) -> pad Cout -> (KH*KW, Cin, Cout_pad), bf16.
    w = jnp.transpose(w_oihw, (2, 3, 1, 0)).astype(jnp.bfloat16)
    w = jnp.pad(w, ((0, 0), (0, 0), (0, 0), (0, Cout_pad - Cout)))
    w = w.reshape(KH * KW, Cin, Cout_pad)

    args = [x, w]
    in_specs = [
        pl.BlockSpec((TN, 1, sw, Ws_arr, Cin),
                     lambda nb, ho, kh: (nb, ho * sh + kh * dh, 0, 0, 0)),
        pl.BlockSpec((KH * KW, Cin, Cout_pad),       # whole weight, resident
                     lambda nb, ho, kh: (0, 0, 0)),
    ]
    if has_bias:
        b = jnp.pad(bias.astype(jnp.float32), (0, Cout_pad - Cout))
        args.append(b.reshape(1, Cout_pad))
        in_specs.append(pl.BlockSpec((1, Cout_pad), lambda nb, ho, kh: (0, 0)))

    kernel = functools.partial(_conv_tap_kernel, KW=KW, Wo=Wo, sw=sw, dw=dw,
                               has_bias=has_bias)

    flops = 2 * Npad * Ho * Wo * KH * KW * Cin * Cout_pad
    bytes_accessed = (Npad * Ho * KH * sw * Ws_arr * Cin * 2   # x (re-read KH x)
                      + KH * KW * Cin * Cout_pad * 2           # weights
                      + Npad * Ho * Wo * Cout_pad * 4)         # output

    out = pl.pallas_call(
        kernel,
        out_shape=jax.ShapeDtypeStruct((Npad, Ho, Wo, Cout_pad), jnp.float32),
        grid_spec=pltpu.PrefetchScalarGridSpec(
            num_scalar_prefetch=0,
            grid=(Npad // TN, Ho, KH),
            in_specs=in_specs,
            out_specs=pl.BlockSpec((TN, 1, Wo, Cout_pad),
                                   lambda nb, ho, kh: (nb, ho, 0, 0)),
        ),
        compiler_params=pltpu.CompilerParams(
            dimension_semantics=("parallel", "parallel", "arbitrary"),
            vmem_limit_bytes=40 * 1024 * 1024,
        ),
        cost_estimate=pl.CostEstimate(flops=flops, transcendentals=0,
                                      bytes_accessed=bytes_accessed),
    )(*args)

    out = out[:N, :, :, :Cout]                     # drop batch / Cout padding
    return jnp.transpose(out, (0, 3, 1, 2))        # back to NCHW (f32)


# ----------------------------------------------------------------------------
# aten.convolution.default wrapper (NCHW / OIHW, like PyTorch)
# ----------------------------------------------------------------------------
@functools.partial(
    jax.jit,
    static_argnames=("stride", "padding", "dilation", "transposed",
                     "output_padding", "groups"),
)
def aten_convolution(x_nchw, w_oihw, bias=None, *, stride=(1, 1),
                     padding=(0, 0), dilation=(1, 1), transposed=False,
                     output_padding=(0, 0), groups=1):
    if transposed:
        raise NotImplementedError("transposed convolution not supported")
    if groups != 1:
        # TODO(synk): grouped / depthwise convolution path not implemented.
        raise NotImplementedError("groups != 1 not supported in this kernel")

    N, Cin, H, W = x_nchw.shape
    Cout, Cin_w, KH, KW = w_oihw.shape
    assert Cin_w == Cin
    sh, sw = stride
    ph, pw = padding
    dh, dw = dilation

    Ho = (H + 2 * ph - dh * (KH - 1) - 1) // sh + 1
    Wo = (W + 2 * pw - dw * (KW - 1) - 1) // sw + 1

    # Lane-dense output channels (multiple of 128) -> unmasked vst.
    Cout_pad = -(-Cout // 128) * 128

    if KH == 1 and KW == 1:
        return _conv_1x1(x_nchw, w_oihw, bias, sh=sh, sw=sw, ph=ph, pw=pw,
                         Ho=Ho, Wo=Wo, Cout_pad=Cout_pad)
    return _conv_kxk(x_nchw, w_oihw, bias, sh=sh, sw=sw, ph=ph, pw=pw,
                     dh=dh, dw=dw, KH=KH, KW=KW, Ho=Ho, Wo=Wo,
                     Cout_pad=Cout_pad)


# ----------------------------------------------------------------------------
# main
# ----------------------------------------------------------------------------
if __name__ == "__main__":
    key = jax.random.PRNGKey(0)
    kx1, kw1, kx2, kw2, kb2 = jax.random.split(key, 5)

    # --- Test 1: 3x3 stride-2 conv (EfficientNet-Lite3 stem shape, scaled
    #     down; no bias) -> general KxK path.
    N, Cin, H, W = 2, 4, 16, 16
    Cout, KH, KW = 8, 3, 3
    stride, padding, dilation, groups = (2, 2), (1, 1), (1, 1), 1

    x = jax.random.normal(kx1, (N, Cin, H, W), dtype=jnp.float32)
    w = jax.random.normal(kw1, (Cout, Cin, KH, KW), dtype=jnp.float32) * 0.1

    out = aten_convolution(x, w, None, stride=stride, padding=padding,
                           dilation=dilation, groups=groups)
    out = jax.block_until_ready(out)

    ref = jax.lax.conv_general_dilated(
        x.astype(jnp.bfloat16), w.astype(jnp.bfloat16),
        window_strides=stride, padding=[(1, 1), (1, 1)],
        rhs_dilation=dilation,
        dimension_numbers=("NCHW", "OIHW", "NCHW"),
        preferred_element_type=jnp.float32,
    )
    assert out.shape == ref.shape, (out.shape, ref.shape)
    assert jnp.allclose(out, ref, atol=2e-3, rtol=2e-3), "3x3 mismatch vs ref"

    # --- Test 2: 1x1 pointwise conv with bias -> flat-matmul fast path.
    N2, Cin2, H2, W2, Cout2 = 2, 8, 16, 16, 16
    x2 = jax.random.normal(kx2, (N2, Cin2, H2, W2), dtype=jnp.float32)
    w2 = jax.random.normal(kw2, (Cout2, Cin2, 1, 1), dtype=jnp.float32) * 0.1
    b2 = jax.random.normal(kb2, (Cout2,), dtype=jnp.float32) * 0.1

    out2 = aten_convolution(x2, w2, b2, stride=(1, 1), padding=(0, 0),
                            dilation=(1, 1), groups=1)
    out2 = jax.block_until_ready(out2)

    ref2 = jax.lax.conv_general_dilated(
        x2.astype(jnp.bfloat16), w2.astype(jnp.bfloat16),
        window_strides=(1, 1), padding=[(0, 0), (0, 0)],
        dimension_numbers=("NCHW", "OIHW", "NCHW"),
        preferred_element_type=jnp.float32,
    ) + b2.reshape(1, -1, 1, 1)
    assert out2.shape == ref2.shape, (out2.shape, ref2.shape)
    assert jnp.allclose(out2, ref2, atol=2e-3, rtol=2e-3), "1x1 mismatch vs ref"

    print("KERNEL_OK")
</pallas_src>

<mosaic_0001>
module attributes {stable_mosaic.version = 11 : i64} {
  func.func @_conv_tap_kernel(%arg0: i32, %arg1: i32, %arg2: i32, %arg3: memref<2x1x2x9x4xbf16, #tpu.memory_space<vmem>>, %arg4: memref<9x4x128xbf16, #tpu.memory_space<vmem>>, %arg5: memref<2x1x8x128xf32, #tpu.memory_space<vmem>>) attributes {dimension_semantics = [#tpu.dimension_semantics<parallel>, #tpu.dimension_semantics<parallel>, #tpu.dimension_semantics<arbitrary>], iteration_bounds = array<i64: 1, 8, 3>, scalar_prefetch = 0 : i64, scratch_operands = 0 : i64, tpu.core_type = #tpu.core_type<tc>, window_params = [{transform_indices = @transform_0, window_bounds = array<i64: 2, 1, 2, 9, 4>}, {pipeline_mode = #tpu.pipeline_mode<synchronous>, transform_indices = @transform_1, window_bounds = array<i64: 9, 4, 128>}, {transform_indices = @transform_2, window_bounds = array<i64: 2, 1, 8, 128>}]} {
    %c0 = arith.constant 0 : index
    %c0_0 = arith.constant 0 : index
    %c0_1 = arith.constant 0 : index
    %c0_2 = arith.constant 0 : index
    %c0_3 = arith.constant 0 : index
    %0 = vector.load %arg3[%c0, %c0_0, %c0_1, %c0_2, %c0_3] : memref<2x1x2x9x4xbf16, #tpu.memory_space<vmem>>, vector<2x1x1x8x4xbf16>
    %1 = vector.shape_cast %0 : vector<2x1x1x8x4xbf16> to vector<2x8x4xbf16>
    %2 = vector.shape_cast %1 : vector<2x8x4xbf16> to vector<16x4xbf16>
    %c3_i32 = arith.constant 3 : i32
    %3 = arith.muli %arg2, %c3_i32 : i32
    %c0_i32 = arith.constant 0 : i32
    %4 = arith.addi %3, %c0_i32 : i32
    %5 = arith.index_cast %4 : i32 to index
    %c0_4 = arith.constant 0 : index
    %c0_5 = arith.constant 0 : index
    %6 = vector.load %arg4[%5, %c0_4, %c0_5] : memref<9x4x128xbf16, #tpu.memory_space<vmem>>, vector<1x4x128xbf16>
    %7 = vector.shape_cast %6 : vector<1x4x128xbf16> to vector<4x128xbf16>
    %cst = arith.constant dense<0.000000e+00> : vector<16x128xf32>
    %8 = tpu.matmul %2, %7, %cst {dimension_numbers = #tpu.dot_dimension_numbers<[1], [0], [0], [1], [0, 0, 1, 1], [], []>} : vector<16x4xbf16>, vector<4x128xbf16>, vector<16x128xf32> -> vector<16x128xf32>
    %c0_6 = arith.constant 0 : index
    %c0_7 = arith.constant 0 : index
    %c1 = arith.constant 1 : index
    %c0_8 = arith.constant 0 : index
    %c0_9 = arith.constant 0 : index
    %9 = vector.load %arg3[%c0_6, %c0_7, %c1, %c0_8, %c0_9] : memref<2x1x2x9x4xbf16, #tpu.memory_space<vmem>>, vector<2x1x1x8x4xbf16>
    %10 = vector.shape_cast %9 : vector<2x1x1x8x4xbf16> to vector<2x8x4xbf16>
    %11 = vector.shape_cast %10 : vector<2x8x4xbf16> to vector<16x4xbf16>
    %c3_i32_10 = arith.constant 3 : i32
    %12 = arith.muli %arg2, %c3_i32_10 : i32
    %c1_i32 = arith.constant 1 : i32
    %13 = arith.addi %12, %c1_i32 : i32
    %14 = arith.index_cast %13 : i32 to index
    %c0_11 = arith.constant 0 : index
    %c0_12 = arith.constant 0 : index
    %15 = vector.load %arg4[%14, %c0_11, %c0_12] : memref<9x4x128xbf16, #tpu.memory_space<vmem>>, vector<1x4x128xbf16>
    %16 = vector.shape_cast %15 : vector<1x4x128xbf16> to vector<4x128xbf16>
    %cst_13 = arith.constant dense<0.000000e+00> : vector<16x128xf32>
    %17 = tpu.matmul %11, %16, %cst_13 {dimension_numbers = #tpu.dot_dimension_numbers<[1], [0], [0], [1], [0, 0, 1, 1], [], []>} : vector<16x4xbf16>, vector<4x128xbf16>, vector<16x128xf32> -> vector<16x128xf32>
    %18 = arith.addf %8, %17 : vector<16x128xf32>
    %c0_14 = arith.constant 0 : index
    %c0_15 = arith.constant 0 : index
    %c0_16 = arith.constant 0 : index
    %c1_17 = arith.constant 1 : index
    %c0_18 = arith.constant 0 : index
    %19 = vector.load %arg3[%c0_14, %c0_15, %c0_16, %c1_17, %c0_18] : memref<2x1x2x9x4xbf16, #tpu.memory_space<vmem>>, vector<2x1x1x8x4xbf16>
    %20 = vector.shape_cast %19 : vector<2x1x1x8x4xbf16> to vector<2x8x4xbf16>
    %21 = vector.shape_cast %20 : vector<2x8x4xbf16> to vector<16x4xbf16>
    %c3_i32_19 = arith.constant 3 : i32
    %22 = arith.muli %arg2, %c3_i32_19 : i32
    %c2_i32 = arith.constant 2 : i32
    %23 = arith.addi %22, %c2_i32 : i32
    %24 = arith.index_cast %23 : i32 to index
    %c0_20 = arith.constant 0 : index
    %c0_21 = arith.constant 0 : index
    %25 = vector.load %arg4[%24, %c0_20, %c0_21] : memref<9x4x128xbf16, #tpu.memory_space<vmem>>, vector<1x4x128xbf16>
    %26 = vector.shape_cast %25 : vector<1x4x128xbf16> to vector<4x128xbf16>
    %cst_22 = arith.constant dense<0.000000e+00> : vector<16x128xf32>
    %27 = tpu.matmul %21, %26, %cst_22 {dimension_numbers = #tpu.dot_dimension_numbers<[1], [0], [0], [1], [0, 0, 1, 1], [], []>} : vector<16x4xbf16>, vector<4x128xbf16>, vector<16x128xf32> -> vector<16x128xf32>
    %28 = arith.addf %18, %27 : vector<16x128xf32>
    %29 = vector.shape_cast %28 : vector<16x128xf32> to vector<2x1x8x128xf32>
    %c0_i32_23 = arith.constant 0 : i32
    %30 = arith.cmpi eq, %arg2, %c0_i32_23 : i32
    %31 = arith.extui %30 : i1 to i32
    %c0_i32_24 = arith.constant 0 : i32
    %32 = arith.cmpi ne, %31, %c0_i32_24 : i32
    scf.if %32 {
      %c0_27 = arith.constant 0 : index
      %c0_28 = arith.constant 0 : index
      %c0_29 = arith.constant 0 : index
      %c0_30 = arith.constant 0 : index
      %36 = vector.load %arg5[%c0_27, %c0_28, %c0_29, %c0_30] : memref<2x1x8x128xf32, #tpu.memory_space<vmem>>, vector<2x1x8x128xf32>
      tpu.vector_store %arg5[%c0_27, %c0_28, %c0_29, %c0_30], %29 {strides = array<i32>} : memref<2x1x8x128xf32, #tpu.memory_space<vmem>>, vector<2x1x8x128xf32>,
    } else {
    }
    %c0_i32_25 = arith.constant 0 : i32
    %33 = arith.cmpi ne, %arg2, %c0_i32_25 : i32
    %34 = arith.extui %33 : i1 to i32
    %c0_i32_26 = arith.constant 0 : i32
    %35 = arith.cmpi ne, %34, %c0_i32_26 : i32
    scf.if %35 {
      %c0_27 = arith.constant 0 : index
      %c0_28 = arith.constant 0 : index
      %c0_29 = arith.constant 0 : index
      %c0_30 = arith.constant 0 : index
      %36 = vector.load %arg5[%c0_27, %c0_28, %c0_29, %c0_30] : memref<2x1x8x128xf32, #tpu.memory_space<vmem>>, vector<2x1x8x128xf32>
      %37 = arith.addf %36, %29 : vector<2x1x8x128xf32>
      %c0_31 = arith.constant 0 : index
      %c0_32 = arith.constant 0 : index
      %c0_33 = arith.constant 0 : index
      %c0_34 = arith.constant 0 : index
      %38 = vector.load %arg5[%c0_31, %c0_32, %c0_33, %c0_34] : memref<2x1x8x128xf32, #tpu.memory_space<vmem>>, vector<2x1x8x128xf32>
      tpu.vector_store %arg5[%c0_31, %c0_32, %c0_33, %c0_34], %37 {strides = array<i32>} : memref<2x1x8x128xf32, #tpu.memory_space<vmem>>, vector<2x1x8x128xf32>,
    } else {
    }
    return
  }
  func.func @transform_0(%arg0: i32, %arg1: i32, %arg2: i32) -> (i32, i32, i32, i32, i32) {
    %c2_i32 = arith.constant 2 : i32
    %0 = arith.muli %arg1, %c2_i32 : i32
    %c1_i32 = arith.constant 1 : i32
    %1 = arith.muli %arg2, %c1_i32 : i32
    %2 = arith.addi %0, %1 : i32
    %c0_i32 = arith.constant 0 : i32
    %c0_i32_0 = arith.constant 0 : i32
    %c0_i32_1 = arith.constant 0 : i32
    %c0_i32_2 = arith.constant 0 : i32
    return %arg0, %2, %c0_i32, %c0_i32_0, %c0_i32_1 : i32, i32, i32, i32, i32
  }
  func.func @transform_1(%arg0: i32, %arg1: i32, %arg2: i32) -> (i32, i32, i32) {
    %c0_i32 = arith.constant 0 : i32
    %c0_i32_0 = arith.constant 0 : i32
    %c0_i32_1 = arith.constant 0 : i32
    %c0_i32_2 = arith.constant 0 : i32
    return %c0_i32, %c0_i32_0, %c0_i32_1 : i32, i32, i32
  }
  func.func @transform_2(%arg0: i32, %arg1: i32, %arg2: i32) -> (i32, i32, i32, i32) {
    %c0_i32 = arith.constant 0 : i32
    %c0_i32_0 = arith.constant 0 : i32
    %c0_i32_1 = arith.constant 0 : i32
    return %arg0, %arg1, %c0_i32, %c0_i32_0 : i32, i32, i32, i32
  }
}

</mosaic_0001>

<bundles_post_ra>
// kernel: aten_convolution.1
= control target key start
LH: loop header
LB: loop body
LE: loop exit
PB: predicated region body
PF: predicated region fallthrough
CT: control target
= control target key end

     0   :  { %s833_s9 = smov 0   ;;  %s835_s10 = smov 0   ;;  %s969_s0 = inlined_call_operand.vmem [shape: bf16[2,18,2,9,4], index: 0, kind: input, shape index: {}]   ;;  %s970_s1 = inlined_call_operand.vmem [shape: bf16[9,4,128], index: 1, kind: input, shape index: {}]   ;;  %s971_s2 = inlined_call_operand.vmem [shape: f32[2,8,8,128], index: 2, kind: output, shape index: {}]  }
   0x1   :  { %s837_s11 = smov 0   ;;  %s839_s12 = smov 0  }
   0x2   :  { %s841_s13 = smov 0   ;;  %s843_s14 = smov 0  }
   0x3   :  { %s845_s15 = smov 0   ;;  %s847_s16 = smov 0  }
   0x4   :  { %s849_s17 = smov 0  }
   0x5 LB: > { %s610_s18 = sadd.s32 4294967295, %s814_s17   ;;  %s24_s19 = sadd.s32 1, %s806_s15  ;;  %s814_s17 = sphi %s849_s17, %s12_s17   ;;  %s810_s16 = sphi %s847_s16, %s980_s16   ;;  %s806_s15 = sphi %s845_s15, %s979_s15   ;;  %s802_s14 = sphi %s843_s14, %s978_s14   ;;  %s798_s13 = sphi %s841_s13, %s977_s13   ;;  %s794_s12 = sphi %s839_s12, %s976_s12   ;;  %s790_s11 = sphi %s837_s11, %s975_s11   ;;  %s786_s10 = sphi %s835_s10, %s974_s10   ;;  %s782_s9 = sphi %s833_s9, %s973_s9  }
   0x6   : > { %p25_p0 = scmp.ge.s32.totalorder %s24_s19, 3  ;;  %s27_s20 = sadd.s32 1, %s810_s16 }
   0x7   : > { %s612_s21 = sshll.u32 %s810_s16, 1  ;;  %s44_s22 = sadd.s32 1, %s794_s12 }
   0x8   : > { %s982_s19 = smov (%p25_p0, %s24_s19), 0  ;;  %s984_s20 = smov (!%p25_p0, %s27_s20), %s810_s16 }
   0x9   : > { %s36_s23 = sadd.s32 %s806_s15, %s612_s21  ;;  %p51_p1 = scmp.ne.s32.totalorder %s794_s12, %s790_s11 }
   0xa   : > { %p29_p2 = scmp.ge.s32.totalorder %s984_s20, 8  ;;  %p52_p3 = scmp.eq.s32.totalorder %s814_s17, 0 }
   0xb   : > { %s93_s24 = sadd.s32 1, %s786_s10  ;;  %p103_p4 = scmp.ne.s32.totalorder %s786_s10, %s782_s9 }
   0xc   : > { %s986_s20 = smov (%p29_p2, %s984_s20), 0  ;;  %p53_p5 = por %p52_p3, %p51_p1 }
   0xd   : > { %p104_p6 = scmp.eq.s32.totalorder %s610_s18, 23  ;;  %s613_s25 = sshll.u32 %s986_s20, 1 }
   0xe   : > { %s89_s26 = ssub.s32 %s810_s16, %s986_s20  ;;  %s38_s27 = sadd.s32 %s613_s25, %s982_s19 }
   0xf   : > { %p91_p7 = scmp.eq.s32.totalorder %s89_s26, 0  ;;  %s40_s28 = ssub.s32 %s36_s23, %s38_s27 }
  0x10   : > { %p899_p8 = por %p104_p6, %p103_p4  ;;  %p42_p9 = scmp.eq.s32.totalorder %s40_s28, 0 }
  0x11   : > { %s904_s30 = scalar_select %p91_p7, %s786_s10, %s93_s24  }
  0x12   : > { %s907_s3 = scalar_select %p42_p9, %s794_s12, %s44_s22  }
  0x13   : > { %p615_p10 = scmp.ge.s32.totalorder %s814_s17, 24 }
  0x15   : > { %129 = sbr.rel (%p615_p10) target bundleno = 32 (0x20), region = 20 }
  0x1a   : > { %132 = sbr.rel (!%p53_p5) target bundleno = 32 (0x20), region = 24  ;;  %s134_s4 = sand.u32 (%p53_p5), 1, %s794_s12  }
  0x1b   : > { %s642_s5 = sshll.u32 (%p53_p5), %s36_s23, 4  ;;  %s616_s6 = sshll.u32 (%p53_p5), %s134_s4, 5 }
  0x1c   : > { %s144_s18 = scalar_lea.vmem (%p53_p5), %s969_s0, %s642_s5  ;;  %s136_s21 = scalar_lea.vmem (%p53_p5), [#allocation2], %s616_s6 }
  0x1d   : > { %v161_v0 = vld [vmem:[%s144_s18] sm:$0xff] (%p53_p5)   ;;  %v165_v1 = vld [vmem:[%s144_s18 + $0x8] sm:$0xff] (%p53_p5)  }
  0x1e   : > { %v169_v2 = vld [vmem:[%s144_s18 + $0x120] sm:$0xff] (%p53_p5)   ;;  %162 = vst [vmem:[%s136_s21] sm:$0xff] (%p53_p5), %v161_v0   ;;  %166 = vst [vmem:[%s136_s21 + $0x8] sm:$0xff] (%p53_p5), %v165_v1   ;;  %v173_v3 = vld [vmem:[%s144_s18 + $0x128] sm:$0xff] (%p53_p5)  }
  0x1f   : > { %170 = vst [vmem:[%s136_s21 + $0x10] sm:$0xff] %v169_v2   ;;  %174 = vst [vmem:[%s136_s21 + $0x18] sm:$0xff] %v173_v3  }
  0x20 PF: > { %p620_p11 = scmp.ge.s32.totalorder %s814_s17, 1  ;;  %p215_p12 = scmp.lt.s32.totalorder %s814_s17, 25 }
  0x22   : > { %p216_p13 = pnand %p620_p11, %p215_p12 }
  0x23   : > { %s239_s22 = sand.u32 (!%p216_p13), 1, %s782_s9   ;;  %s643_s23 = smul.u32 (!%p216_p13), 6, %s798_s13 }
  0x24   : > { %219 = sbr.rel (%p216_p13) target bundleno = 276 (0x114), region = 65  ;;  %s918_s24 = sshll.u32 (!%p216_p13), %s239_s22, 4 }
  0x25   : > { %s222_s25 = sand.u32 (!%p216_p13), 1, %s790_s11   ;;  %s251_s28 = scalar_lea.vmem (!%p216_p13), %s970_s1, %s643_s23 }
  0x26   : > { %s621_s9 = sshll.u32 (!%p216_p13), %s222_s25, 5  ;;  %s241_s4 = scalar_lea.vmem (!%p216_p13), [#allocation3], %s918_s24 }
  0x27   : > { %s224_s11 = scalar_lea.vmem (!%p216_p13), [#allocation2], %s621_s9  ;;  %p636_p0 = scmp.ne.s32.totalorder (!%p216_p13), %s798_s13, 0 }
  0x29   : > { %v816_v4 = vmov 0.0   ;;  %vm269_vm0 = vcmask 1041408   ;;  %vm817_vm1 = vmmov 0   ;;  %v627_v5 = vld [vmem:[%s251_s28 + $0x2] sm:$0x3]  ;;  %vm265_vm2 = vcmask 31744  }
  0x2a   : > { %650 = vmatprep.subr.bf16.mxu0 %v816_v4  ;;  %656 = vmatprep.subr.bf16.mxu1 %v816_v4  ;;  %v252_v6 = vld [vmem:[%s251_s28] sm:$0x3]  ;;  %v271_v7 = vsel %vm269_vm0, %v627_v5, 0  ;;  %v633_v9 = vld [vmem:[%s251_s28 + $0x4] sm:$0x3] }
  0x2b   : > { %652 = vmatprep.mubr.msk.bf16.mxu0 %vm817_vm1, %v816_v4  ;;  %658 = vmatprep.mubr.msk.bf16.mxu1 %vm817_vm1, %v816_v4  ;;  %v323_v8 = vsel %vm269_vm0, %v252_v6, 0  ;;  %v742_v10 = vld [vmem:[%s224_s11 + $0x8] ss:$16 sps:$4 sm:$0xff]   ;;  %v743_v11 = vld [vmem:[%s224_s11] ss:$16 sps:$4 sm:$0xff]   ;;  %v412_v12 = vsel %vm269_vm0, %v633_v9, 0 }
  0x2c   : > { %651 = vmatpush3.bf16.msra.mxu0 %v271_v7  ;;  %657 = vmatpush3.bf16.msra.mxu1 %v323_v8  ;;  %v366_v13 = vld [vmem:[%s224_s11] sm:$0xf]  ;;  %v367_v14 = vld [vmem:[%s224_s11 + $0x4] sm:$0x1]  ;;  %v368_v15 = vld [vmem:[%s224_s11 + $0x10] sm:$0xf] }
  0x2d   : > { %662 = vmatprep.subr.bf16.mxu0 %v816_v4  ;;  %v369_v16 = vld [vmem:[%s224_s11 + $0x14] sm:$0x1]  ;;  %v374_v17 = vshrl.u32 %v366_v13, 16  ;;  %v377_v18 = vshll.u32 %v366_v13, 16  ;;  %v383_v19 = vshll.u32 %v367_v14, 16  ;;  %v388_v20 = vshrl.u32 %v368_v15, 16 }
  0x2e   : > { %v391_v21 = vshll.u32 %v368_v15, 16  ;;  %v397_v22 = vshll.u32 %v369_v16, 16  ;;  %vm370_vm3 = vsmask.f32 3328  ;;  %vm371_vm4 = vsmask.f32 7440 }
  0x2f   : > { %653 = vmatmul.mubr.msk.bf16.vlgmr.msra.gmra.mxu0 %vm265_vm2, %v742_v10  ;;  %659 = vmatmul.mubr.msk.bf16.vlgmr.msra.gmra.mxu1 %vm265_vm2, %v743_v11  ;;  %v376_v23 = vrot.slane %v374_v17, 4  ;;  %v379_v24 = vrot.slane %v377_v18, 5  ;;  %v390_v25 = vrot.slane %v388_v20, 4  ;;  %v385_v28 = vrot.slane %v383_v19, 5  ;;  %vm372_vm5 = vmor %vm370_vm3, %vm371_vm4 }
  0x30   : > { %663 = vmatpush3.bf16.msra.mxu0 %v412_v12  ;;  %664 = vmatprep.mubr.msk.bf16.mxu0 %vm817_vm1, %v816_v4  ;;  %v393_v26 = vrot.slane %v391_v21, 5  ;;  %v399_v30 = vrot.slane %v397_v22, 5 }
  0x31   : > { %v380_v27 = vor.u32 %v379_v24, %v376_v23 }
  0x32   : > { %v394_v29 = vor.u32 %v393_v26, %v390_v25 }
  0x33   : > { %v381_v31 = vrot.slane %v380_v27, 4 }
  0x34   : > { %v395_v32 = vrot.slane %v394_v29, 4 }
  0x35   : > { %v386_v33 = vsel %vm372_vm5, %v381_v31, %v385_v28 }
  0x36   : > { %v400_v34 = vsel %vm372_vm5, %v395_v32, %v399_v30 }
  0x37   : > { %v634_v35 = vcombine.low %v386_v33, %v400_v34 }
  0x39   : > { %665 = vmatmul.mubr.msk.bf16.vlgmr.msra.gmra.mxu0 %vm265_vm2, %v634_v35 }
  0xef   : > { %v307_v36 = vpop.f32.mrf.mxu0  ;;  %v359_v37 = vpop.f32.mrf.mxu1 }
  0xf0   : > { %v360_v44 = vadd.f32 %v359_v37, %v307_v36 }
  0xf1   : > { %v654_v38 = vpop.f32.mrf.mxu0  ;;  %v660_v39 = vpop.f32.mrf.mxu1 }
  0xf3   : > { %v310_v40 = vpop.f32.mrf.mxu0  ;;  %v362_v41 = vpop.f32.mrf.mxu1 }
  0xf4   : > { %v363_v48 = vadd.f32 %v362_v41, %v310_v40 }
  0xf5   : > { %v655_v42 = vpop.f32.mrf.mxu0  ;;  %v661_v43 = vpop.f32.mrf.mxu1 }
  0xf9   : > { %v448_v45 = vpop.f32.mrf.mxu0 }
  0xfa   : > { %v455_v46 = vadd.f32 %v448_v45, %v360_v44 }
  0xfb   : > { %v666_v47 = vpop.f32.mrf.mxu0  ;;  %460 = sbr.rel (%p636_p0) target bundleno = 257 (0x101), region = 73 }
  0xfd   : > { %v451_v49 = vpop.f32.mrf.mxu0 }
  0xfe   : > { %v456_v50 = vadd.f32 %v451_v49, %v363_v48 }
  0xff   : > { %v667_v51 = vpop.f32.mrf.mxu0 }
 0x100   : > { %461 = vst [vmem:[%s241_s4] sm:$0xff] %v455_v46  ;;  %462 = vst [vmem:[%s241_s4 + $0x8] sm:$0xff] %v456_v50 }
 0x101 PF: > { %p637_p1 = scmp.eq.s32.totalorder %s798_s13, 0 }
 0x103   : > { %466 = sbr.rel (%p637_p1) target bundleno = 268 (0x10c), region = 77 }
 0x108   : > { %v467_v52 = vld [vmem:[%s241_s4] sm:$0xff]  ;;  %v468_v53 = vld [vmem:[%s241_s4 + $0x8] sm:$0xff] }
 0x109   : > { %v469_v54 = vadd.f32 %v467_v52, %v455_v46  ;;  %v470_v55 = vadd.f32 %v468_v53, %v456_v50 }
 0x10b   : > { %471 = vst [vmem:[%s241_s4] sm:$0xff] %v469_v54  ;;  %472 = vst [vmem:[%s241_s4 + $0x8] sm:$0xff] %v470_v55 }
 0x10c PF: > { %479 = sbr.rel (!%p899_p8) target bundleno = 276 (0x114), region = 81  ;;  %s639_s5 = sshll.u32 (%p899_p8), %s802_s14, 3 }
 0x10d   : > { %s484_s8 = scalar_lea.vmem (%p899_p8), %s971_s2, %s639_s5 }
 0x112   : > { %v515_v56 = vld [vmem:[%s241_s4] sm:$0xff]  ;;  %v517_v57 = vld [vmem:[%s241_s4 + $0x8] sm:$0xff] }
 0x113   : > { %516 = vst [vmem:[%s484_s8] sm:$0xff] %v515_v56  ;;  %518 = vst [vmem:[%s484_s8 + $0x40] sm:$0xff] %v517_v57 }
 0x114 PF: > { %s12_s17 = sadd.s32 1, %s814_s17   ;;  %s973_s9 = smov %s786_s10 }
 0x115   : > { %p9_p2 = scmp.ge.s32.totalorder %s12_s17, 26   ;;  %s974_s10 = smov %s904_s30 }
 0x116   : > { %s975_s11 = smov %s794_s12  ;;  %s976_s12 = smov %s907_s3 }
 0x117   : > { %s977_s13 = smov %s806_s15  ;;  %s978_s14 = smov %s810_s16 }
 0x118   : > { %s979_s15 = smov %s982_s19  ;;  %s980_s16 = smov %s986_s20 }
 0x119   :  { %11 = sbr.rel (!%p9_p2) target bundleno = 5 (0x5), region = 154 }

</bundles_post_ra>
